<compile_context>
chip_gen: v7x
topology: tpu7x:2x2x1
jax: 0.10.0
libtpu: 0.0.40
codegen_flags: <defaults>
</compile_context>

<pallas_src>
import math
from functools import partial

import jax
import jax.numpy as jnp
from jax import lax
from jax.experimental import pallas as pl
from jax.experimental.pallas import tpu as pltpu


# --------------------------------------------------------------------------
# Kernels
# --------------------------------------------------------------------------
def _grn_fused_kernel(x_ref, gamma_ref, beta_ref, o_ref, *, num_folds, fold_c, eps):
    """Single pass per batch: sumsq -> Gx -> Nx -> gamma*(x*Nx)+beta+x."""
    xt = x_ref[0].astype(jnp.float32)                        # (Sf, Cf)
    sumsq = jnp.sum(xt * xt, axis=0, keepdims=True)          # (1, Cf)

    # Reduce the F folded copies of each channel with circular lane rotates:
    # after summing all F rolls by multiples of C, every lane holds the full
    # per-channel sum (already replicated in folded layout).
    total = sumsq
    for f in range(1, num_folds):
        total = total + pltpu.roll(sumsq, shift=f * fold_c, axis=1)

    gx = jnp.sqrt(total)                                     # (1, Cf)
    # mean over the Cf lanes equals mean over the C channels (F-fold replication).
    mean_gx = jnp.sum(gx, axis=1, keepdims=True) / gx.shape[1]   # (1, 1)
    nx = gx / (mean_gx + eps)                                # (1, Cf)
    scale = gamma_ref[...] * nx + 1.0                        # gamma*Nx + 1
    o_ref[0] = (xt * scale + beta_ref[...]).astype(o_ref.dtype)


def _grn_sumsq_kernel(x_ref, o_ref, *, ts, sf, blocks_per_chunk):
    """Accumulate per-(batch, chunk, folded-channel) sum of squares over tiles."""
    s = pl.program_id(2)

    @pl.when(s == 0)
    def _():
        o_ref[...] = jnp.zeros_like(o_ref)

    xt = x_ref[0].astype(jnp.float32)                        # (TS, Cf)
    if sf % ts != 0:
        # Ragged last tile: out-of-bounds rows contain garbage -> mask them.
        c = pl.program_id(1)
        blk = c * blocks_per_chunk + s
        rows_valid = sf - blk * ts
        row = lax.broadcasted_iota(jnp.int32, xt.shape, 0)
        xt = jnp.where(row < rows_valid, xt, 0.0)
    o_ref[0] += jnp.sum(xt * xt, axis=0, keepdims=True)      # (1, Cf)


def _grn_apply_kernel(x_ref, scale_ref, beta_ref, o_ref):
    """out = x * scale + beta, scale = gamma*Nx + 1 precomputed per batch.

    Partial last blocks need no mask: out-of-bounds output rows are dropped
    by Pallas automatically.
    """
    xt = x_ref[0].astype(jnp.float32)                        # (TS, Cf)
    o_ref[0] = (xt * scale_ref[0] + beta_ref[...]).astype(o_ref.dtype)


# --------------------------------------------------------------------------
# Helpers
# --------------------------------------------------------------------------
def _pick_spatial_tile(sf, cf, itemsize, target_bytes):
    """Largest spatial tile (multiple of 8) with ~target_bytes per block."""
    ts = max(1, int(target_bytes) // (cf * itemsize))
    if ts >= sf:
        return sf
    return max(8, (ts // 8) * 8)


def _vmem_budget_bytes():
    """~75% of this chip's per-core VMEM (v5e/v6e: 128 MiB, v7x: 64 MiB)."""
    try:
        cap = int(getattr(pltpu.get_tpu_info(), "vmem_capacity_bytes", 0))
    except Exception:
        cap = 0
    if cap <= 0:
        cap = 64 << 20          # conservative (v7x) fallback
    return (cap * 3) // 4


# --------------------------------------------------------------------------
# Wrapper
# --------------------------------------------------------------------------
@partial(jax.jit, static_argnames=("eps", "force_two_pass", "tile_target_bytes"))
def grn(x, gamma, beta, eps=1e-6, force_two_pass=False, tile_target_bytes=2 << 20):
    """GRN forward. x: (B, H, W, C) channels-last; gamma/beta: (1,1,1,C)."""
    B, H, W, C = x.shape
    S = H * W
    itemsize = x.dtype.itemsize
    gamma_flat = gamma.reshape(C).astype(jnp.float32)
    beta_flat = beta.reshape(C).astype(jnp.float32)

    # Generalized lane folding: Cf = C * F is a multiple of 128 whenever the
    # spatial extent is divisible by F (free, contiguous reshape).
    F = 128 // math.gcd(C, 128)
    if S % F != 0:
        F = 1
    Sf, Cf = S // F, C * F

    x_f = x.reshape(B, Sf, Cf)
    gamma_f = jnp.tile(gamma_flat, F).reshape(1, Cf)
    beta_f = jnp.tile(beta_flat, F).reshape(1, Cf)

    vmem_budget = _vmem_budget_bytes()

    # ---------------- fused single-pass path (read x once, write once) -----
    # Footprint: 2x in-block + 2x out-block (double buffered) + ~2 slab-sized
    # f32 temporaries; budget conservatively as 6 * f32 slab + headroom.
    slab_f32 = Sf * Cf * 4
    fused_need = 6 * slab_f32 + (2 << 20)
    if (not force_two_pass) and fused_need <= vmem_budget:
        out_f = pl.pallas_call(
            partial(_grn_fused_kernel, num_folds=F, fold_c=C, eps=float(eps)),
            out_shape=jax.ShapeDtypeStruct((B, Sf, Cf), x.dtype),
            grid=(B,),
            in_specs=[
                pl.BlockSpec((1, Sf, Cf), lambda b: (b, 0, 0)),
                pl.BlockSpec((1, Cf), lambda b: (0, 0)),
                pl.BlockSpec((1, Cf), lambda b: (0, 0)),
            ],
            out_specs=pl.BlockSpec((1, Sf, Cf), lambda b: (b, 0, 0)),
            compiler_params=pltpu.CompilerParams(
                dimension_semantics=("parallel",),
                vmem_limit_bytes=vmem_budget),
            cost_estimate=pl.CostEstimate(
                flops=4 * B * Sf * Cf, transcendentals=B * Cf,
                bytes_accessed=2 * B * Sf * Cf * itemsize),
        )(x_f, gamma_f, beta_f)
        return out_f.reshape(B, H, W, C)

    # ---------------- two-pass fallback (slab too large for VMEM) ----------
    TS = _pick_spatial_tile(Sf, Cf, itemsize, tile_target_bytes)
    nS = pl.cdiv(Sf, TS)
    # Give the reduction a second parallel axis when B == 1 so v7x's second
    # TensorCore is not idle; harmless on v5e/v6e (single core).
    NC = 2 if (B == 1 and nS >= 2 and nS % 2 == 0) else 1
    nSc = nS // NC
    vmem_limit = min(vmem_budget, 32 << 20)

    # pass 1: partial sums of squares per (batch, chunk, folded channel)
    sumsq_part = pl.pallas_call(
        partial(_grn_sumsq_kernel, ts=TS, sf=Sf, blocks_per_chunk=nSc),
        out_shape=jax.ShapeDtypeStruct((B, NC, Cf), jnp.float32),
        grid=(B, NC, nSc),
        in_specs=[pl.BlockSpec((1, TS, Cf), lambda b, c, s: (b, c * nSc + s, 0))],
        out_specs=pl.BlockSpec((1, 1, Cf), lambda b, c, s: (b, c, 0)),
        compiler_params=pltpu.CompilerParams(
            dimension_semantics=("parallel", "parallel", "arbitrary"),
            vmem_limit_bytes=vmem_limit),
        cost_estimate=pl.CostEstimate(
            flops=2 * B * Sf * Cf, transcendentals=0,
            bytes_accessed=B * Sf * Cf * itemsize + 4 * B * NC * Cf),
    )(x_f)

    # tiny per-(B, C) math: Gx, Nx, and gamma folded into a per-batch scale
    sumsq_f = jnp.sum(sumsq_part, axis=1)                       # (B, Cf)
    sumsq = sumsq_f.reshape(B, F, C).sum(axis=1)                # (B, C)
    gx = jnp.sqrt(sumsq)
    nx = gx / (jnp.mean(gx, axis=-1, keepdims=True) + eps)      # (B, C)
    scale = gamma_flat[None, :] * nx + 1.0                      # gamma*Nx + 1
    scale_f = jnp.tile(scale, (1, F)).reshape(B, 1, Cf).astype(jnp.float32)

    # pass 2: out = x * scale + beta (2 VPU ops / element)
    out_f = pl.pallas_call(
        _grn_apply_kernel,
        out_shape=jax.ShapeDtypeStruct((B, Sf, Cf), x.dtype),
        grid=(B, nS),
        in_specs=[
            pl.BlockSpec((1, TS, Cf), lambda b, s: (b, s, 0)),   # x tile
            pl.BlockSpec((1, 1, Cf), lambda b, s: (b, 0, 0)),    # scale (per batch)
            pl.BlockSpec((1, Cf), lambda b, s: (0, 0)),          # beta
        ],
        out_specs=pl.BlockSpec((1, TS, Cf), lambda b, s: (b, s, 0)),
        compiler_params=pltpu.CompilerParams(
            dimension_semantics=("parallel", "parallel"),
            vmem_limit_bytes=vmem_limit),
        cost_estimate=pl.CostEstimate(
            flops=2 * B * Sf * Cf, transcendentals=0,
            bytes_accessed=2 * B * Sf * Cf * itemsize),
    )(x_f, scale_f, beta_f)

    return out_f.reshape(B, H, W, C)


# --------------------------------------------------------------------------
# Reference + self-test
# --------------------------------------------------------------------------
def _reference(x, gamma, beta, eps=1e-6):
    """Pure-JAX reference of the PyTorch GRN forward (f32)."""
    gx = jnp.sqrt(jnp.sum(x * x, axis=(1, 2), keepdims=True))      # (B,1,1,C)
    nx = gx / (jnp.mean(gx, axis=-1, keepdims=True) + eps)
    return gamma * (x * nx) + beta + x


if __name__ == "__main__":
    def check(x, gamma, beta, **kw):
        out = jax.block_until_ready(grn(x, gamma, beta, **kw))
        ref = _reference(x.astype(jnp.float32), gamma.astype(jnp.float32),
                         beta.astype(jnp.float32))
        assert out.shape == x.shape and out.dtype == x.dtype
        tol = 1e-4 if x.dtype == jnp.float32 else 5e-2
        err = float(jnp.max(jnp.abs(out.astype(jnp.float32) - ref)))
        assert err < tol, f"mismatch vs reference, max abs err = {err}"

    key = jax.random.PRNGKey(0)
    kx, kg, kb, kx2 = jax.random.split(key, 4)

    B, H, W, C = 2, 16, 16, 32
    x = jax.random.normal(kx, (B, H, W, C), dtype=jnp.float32)
    # Module initializes gamma/beta to zeros; use small random values so the
    # scale/shift math is actually exercised.
    gamma = 0.1 * jax.random.normal(kg, (1, 1, 1, C), dtype=jnp.float32)
    beta = 0.1 * jax.random.normal(kb, (1, 1, 1, C), dtype=jnp.float32)

    # 1) fused single-pass path (per-batch slab fits in VMEM)
    check(x, gamma, beta)
    # 2) two-pass fallback path
    check(x, gamma, beta, force_two_pass=True)
    # 3) two-pass with ragged spatial tiles (masked last tile) and B=1
    #    chunked reduction (second parallel grid axis)
    x2 = jax.random.normal(kx2, (1, 20, 20, C), dtype=jnp.float32)
    check(x2, gamma, beta, force_two_pass=True, tile_target_bytes=16 * 1024)
    # 4) bf16 activations: halved HBM traffic, f32 math inside the kernels
    check(x.astype(jnp.bfloat16), gamma, beta)

    print("KERNEL_OK")
</pallas_src>

<mosaic_0001>
module attributes {stable_mosaic.version = 11 : i64} {
  func.func @_grn_fused_kernel(%arg0: i32, %arg1: memref<1x64x128xf32, #tpu.memory_space<vmem>>, %arg2: memref<1x128xf32, #tpu.memory_space<vmem>>, %arg3: memref<1x128xf32, #tpu.memory_space<vmem>>, %arg4: memref<1x64x128xf32, #tpu.memory_space<vmem>>) attributes {dimension_semantics = [#tpu.dimension_semantics<parallel>], iteration_bounds = array<i64: 2>, scalar_prefetch = 0 : i64, scratch_operands = 0 : i64, tpu.core_type = #tpu.core_type<tc>, window_params = [{transform_indices = @transform_0, window_bounds = array<i64: 1, 64, 128>}, {pipeline_mode = #tpu.pipeline_mode<synchronous>, transform_indices = @transform_1, window_bounds = array<i64: 1, 128>}, {pipeline_mode = #tpu.pipeline_mode<synchronous>, transform_indices = @transform_2, window_bounds = array<i64: 1, 128>}, {transform_indices = @transform_3, window_bounds = array<i64: 1, 64, 128>}]} {
    %c0 = arith.constant 0 : index
    %c0_0 = arith.constant 0 : index
    %c0_1 = arith.constant 0 : index
    %0 = vector.load %arg1[%c0, %c0_0, %c0_1] : memref<1x64x128xf32, #tpu.memory_space<vmem>>, vector<1x64x128xf32>
    %1 = vector.shape_cast %0 : vector<1x64x128xf32> to vector<64x128xf32>
    %2 = arith.mulf %1, %1 : vector<64x128xf32>
    %cst = arith.constant dense<0.000000e+00> : vector<128xf32>
    %3 = vector.multi_reduction <add>, %2, %cst [0] : vector<64x128xf32> to vector<128xf32>
    %4 = vector.shape_cast %3 : vector<128xf32> to vector<1x128xf32>
    %c32_i32 = arith.constant 32 : i32
    %5 = tpu.dynamic_rotate %4 by %c32_i32 dim 1 : vector<1x128xf32>, i32 -> vector<1x128xf32>
    %6 = arith.addf %4, %5 : vector<1x128xf32>
    %c64_i32 = arith.constant 64 : i32
    %7 = tpu.dynamic_rotate %4 by %c64_i32 dim 1 : vector<1x128xf32>, i32 -> vector<1x128xf32>
    %8 = arith.addf %6, %7 : vector<1x128xf32>
    %c96_i32 = arith.constant 96 : i32
    %9 = tpu.dynamic_rotate %4 by %c96_i32 dim 1 : vector<1x128xf32>, i32 -> vector<1x128xf32>
    %10 = arith.addf %8, %9 : vector<1x128xf32>
    %11 = math.sqrt %10 : vector<1x128xf32>
    %cst_2 = arith.constant dense<0.000000e+00> : vector<1xf32>
    %12 = vector.multi_reduction <add>, %11, %cst_2 [1] : vector<1x128xf32> to vector<1xf32>
    %13 = vector.shape_cast %12 : vector<1xf32> to vector<1x1xf32>
    %cst_3 = arith.constant 1.280000e+02 : f32
    %14 = vector.broadcast %cst_3 : f32 to vector<1x1xf32>
    %15 = arith.divf %13, %14 : vector<1x1xf32>
    %cst_4 = arith.constant 9.99999997E-7 : f32
    %16 = vector.broadcast %cst_4 : f32 to vector<1x1xf32>
    %17 = arith.addf %15, %16 : vector<1x1xf32>
    %18 = vector.broadcast %17 : vector<1x1xf32> to vector<1x128xf32>
    %19 = arith.divf %11, %18 : vector<1x128xf32>
    %c0_5 = arith.constant 0 : index
    %c0_6 = arith.constant 0 : index
    %20 = vector.load %arg2[%c0_5, %c0_6] : memref<1x128xf32, #tpu.memory_space<vmem>>, vector<1x128xf32>
    %21 = arith.mulf %20, %19 : vector<1x128xf32>
    %cst_7 = arith.constant 1.000000e+00 : f32
    %22 = vector.broadcast %cst_7 : f32 to vector<1x128xf32>
    %23 = arith.addf %21, %22 : vector<1x128xf32>
    %24 = vector.broadcast %23 : vector<1x128xf32> to vector<64x128xf32>
    %25 = arith.mulf %1, %24 : vector<64x128xf32>
    %c0_8 = arith.constant 0 : index
    %c0_9 = arith.constant 0 : index
    %26 = vector.load %arg3[%c0_8, %c0_9] : memref<1x128xf32, #tpu.memory_space<vmem>>, vector<1x128xf32>
    %27 = vector.broadcast %26 : vector<1x128xf32> to vector<64x128xf32>
    %28 = arith.addf %25, %27 : vector<64x128xf32>
    %c0_10 = arith.constant 0 : index
    %c0_11 = arith.constant 0 : index
    %c0_12 = arith.constant 0 : index
    %29 = vector.load %arg4[%c0_10, %c0_11, %c0_12] : memref<1x64x128xf32, #tpu.memory_space<vmem>>, vector<1x64x128xf32>
    %30 = vector.shape_cast %29 : vector<1x64x128xf32> to vector<64x128xf32>
    %31 = vector.shape_cast %28 : vector<64x128xf32> to vector<1x64x128xf32>
    tpu.vector_store %arg4[%c0_10, %c0_11, %c0_12], %31 {strides = array<i32>} : memref<1x64x128xf32, #tpu.memory_space<vmem>>, vector<1x64x128xf32>,
    return
  }
  func.func @transform_0(%arg0: i32) -> (i32, i32, i32) {
    %c0_i32 = arith.constant 0 : i32
    %c0_i32_0 = arith.constant 0 : i32
    %c0_i32_1 = arith.constant 0 : i32
    return %arg0, %c0_i32, %c0_i32_0 : i32, i32, i32
  }
  func.func @transform_1(%arg0: i32) -> (i32, i32) {
    %c0_i32 = arith.constant 0 : i32
    %c0_i32_0 = arith.constant 0 : i32
    %c0_i32_1 = arith.constant 0 : i32
    return %c0_i32, %c0_i32_0 : i32, i32
  }
  func.func @transform_2(%arg0: i32) -> (i32, i32) {
    %c0_i32 = arith.constant 0 : i32
    %c0_i32_0 = arith.constant 0 : i32
    %c0_i32_1 = arith.constant 0 : i32
    return %c0_i32, %c0_i32_0 : i32, i32
  }
  func.func @transform_3(%arg0: i32) -> (i32, i32, i32) {
    %c0_i32 = arith.constant 0 : i32
    %c0_i32_0 = arith.constant 0 : i32
    %c0_i32_1 = arith.constant 0 : i32
    return %arg0, %c0_i32, %c0_i32_0 : i32, i32, i32
  }
}

</mosaic_0001>

<bundles_post_ra>
// kernel: tile.11
= control target key start
LH: loop header
LB: loop body
LE: loop exit
PB: predicated region body
PF: predicated region fallthrough
CT: control target
= control target key end

     0   :  { %vm7_vm0 = vcmask 261120   ;;  %s37_s8 = smov 32   ;;  %s38_s9 = smov 64   ;;  %vm13_vm1 = vcmask 1048320   ;;  %vm19_vm2 = vcmask 785920   ;;  %vm25_vm3 = vcmask 523520   ;;  %s55_s0 = inlined_call_operand.vmem [shape: f32[4,32], index: 0, kind: input, shape index: {}]   ;;  %s56_s1 = inlined_call_operand.vmem [shape: f32[1,128], index: 1, kind: output, shape index: {}]  }
   0x1   :  { %v4_v0 = vld [vmem:[%s55_s0] sm:$0xf]  ;;  %s36_s0 = smov 96  }
   0x2   :  { %5 = vst [vmem:[#allocation1] sm:$0xf] %v4_v0 }
   0x9   :  { %v10_v1 = vld [vmem:[#allocation1 + $0x3] sm:$0x1]   ;;  %v22_v2 = vld [vmem:[#allocation1 + $0x1] sm:$0x1]   ;;  %v6_v3 = vld [vmem:[#allocation1] sm:$0x1]  }
   0xa   :  { %11 = vrot.lane.b32.xlu0 %v10_v1, %s36_s0  ;;  %23 = vrot.lane.b32.xlu1 %v22_v2, %s37_s8  ;;  %v16_v4 = vld [vmem:[#allocation1 + $0x2] sm:$0x1]   ;;  %8 = vst.msk [vmem:[#allocation0] sm:$0x1] %vm7_vm0, %v6_v3  }
   0xe   :  { %17 = vrot.lane.b32.xlu0 %v16_v4, %s38_s9 }
  0x7c   :  { %v12_v5 = vpop.permute.xlu0 %11   ;;  %v24_v6 = vpop.permute.xlu1 %23  }
  0x7d   :  { %14 = vst.msk [vmem:[#allocation0] sm:$0x1] %vm13_vm1, %v12_v5  }
  0x80   :  { %v18_v7 = vpop.permute.xlu0 %17  }
  0x81   :  { %20 = vst.msk [vmem:[#allocation0] sm:$0x1] %vm19_vm2, %v18_v7  }
  0x82   :  { %26 = vst.msk [vmem:[#allocation0] sm:$0x1] %vm25_vm3, %v24_v6  }
  0x89   :  { %v30_v8 = vld [vmem:[#allocation0] sm:$0x1] }
  0x8a   :  { %32 = vst [vmem:[%s56_s1] sm:$0x1] %v30_v8 }

// kernel: tile.10
= control target key start
LH: loop header
LB: loop body
LE: loop exit
PB: predicated region body
PF: predicated region fallthrough
CT: control target
= control target key end

     0   :  { %s22_s0 = inlined_call_operand.vmem [shape: f32[32], index: 0, kind: input, shape index: {}]   ;;  %s23_s1 = inlined_call_operand.vmem [shape: f32[4,32], index: 1, kind: output, shape index: {}]  }
   0x1   :  { %v4_v0 = vld [vmem:[%s22_s0] ss:$0 sm:$0xff] }
   0x2   :  { %5 = vst [vmem:[%s23_s1] sm:$0xf] %v4_v0 }

// kernel: grn.1
= control target key start
LH: loop header
LB: loop body
LE: loop exit
PB: predicated region body
PF: predicated region fallthrough
CT: control target
= control target key end

     0   :  { %s380_s12 = smov 0   ;;  %s435_s0 = inlined_call_operand.vmem [shape: f32[2,64,128], index: 0, kind: input, shape index: {}]   ;;  %s436_s1 = inlined_call_operand.vmem [shape: f32[1,128], index: 1, kind: input, shape index: {}]   ;;  %s437_s2 = inlined_call_operand.vmem [shape: f32[1,128], index: 2, kind: input, shape index: {}]   ;;  %s438_s3 = inlined_call_operand.vmem [shape: f32[2,64,128], index: 3, kind: output, shape index: {}]  }
   0x1 LB: > { %s320_s13 = sadd.s32 4294967295, %s355_s12   ;;  %p324_p0 = scmp.ge.s32.totalorder %s355_s12, 1  ;;  %s355_s12 = sphi %s380_s12, %s13_s12  }
   0x2   : > { %p137_p1 = scmp.lt.s32.totalorder %s355_s12, 3 }
   0x4   : > { %p138_p2 = pnand %p324_p0, %p137_p1 }
   0x5   : > { %p161_p3 = scmp.lt.s32.totalorder (!%p138_p2), %s320_s13, 1  ;;  %s357_s18 = smov (!%p138_p2), 32   ;;  %vm216_vm1 = vcmask (!%p138_p2), 1040384   ;;  %v229_v44 = vlaneseq (!%p138_p2)  ;;  %v225_v47 = vld [vmem:[%s436_s1] sm:$0x1] (!%p138_p2) }
   0x6   : > { %141 = sbr.rel (%p138_p2) target bundleno = 357 (0x165), region = 32  ;;  %s358_s19 = smov (!%p138_p2), 96   ;;  %v329_v53 = vld [vmem:[%s437_s2] ss:$0 sm:$0xff] (!%p138_p2) }
   0x7   : > { %s359_s20 = smov (!%p138_p2), 64   ;;  %v230_v45 = vshrl.u32 (!%p138_p2), %v229_v44, 7 }
   0x9   : > { %v231_v49 = vsub.s32 (!%p138_p2), 0, %v230_v45 }
   0xd   : > { %s440_s13 = smov (!%p161_p3, %s320_s13), 1 }
   0xe   : > { %s332_s14 = sshll.u32 %s440_s13, 6 }
   0xf   : > { %s165_s17 = scalar_lea.vmem %s435_s0, %s332_s14  ;;  %s170_s27 = scalar_lea.vmem %s438_s3, %s332_s14 }
  0x10   : > { %v396_v0 = vld [vmem:[%s165_s17] sm:$0xff]  ;;  %v398_v1 = vld [vmem:[%s165_s17 + $0x8] sm:$0xff]  ;;  %v400_v2 = vld [vmem:[%s165_s17 + $0x10] sm:$0xff] }
  0x11   : > { %v402_v3 = vld [vmem:[%s165_s17 + $0x18] sm:$0xff]  ;;  %v179_v4 = vmul.f32 %v396_v0, %v396_v0  ;;  %v180_v5 = vmul.f32 %v398_v1, %v398_v1  ;;  %v181_v6 = vmul.f32 %v400_v2, %v400_v2  ;;  %v410_v7 = vld [vmem:[%s165_s17 + $0x20] sm:$0xff]  ;;  %v176_v10 = vld [vmem:[%s165_s17 + $0x28] sm:$0xff] }
  0x12   : > { %v182_v8 = vmul.f32 %v402_v3, %v402_v3  ;;  %v183_v11 = vmul.f32 %v410_v7, %v410_v7  ;;  %v177_v13 = vld [vmem:[%s165_s17 + $0x30] sm:$0xff]  ;;  %v184_v14 = vmul.f32 %v176_v10, %v176_v10  ;;  %v178_v16 = vld [vmem:[%s165_s17 + $0x38] sm:$0xff] }
  0x13   : > { %v187_v9 = vadd.f32 %v180_v5, %v179_v4  ;;  %v185_v17 = vmul.f32 %v177_v13, %v177_v13  ;;  %v186_v19 = vmul.f32 %v178_v16, %v178_v16 }
  0x15   : > { %v188_v12 = vadd.f32 %v187_v9, %v181_v6 }
  0x17   : > { %v189_v15 = vadd.f32 %v188_v12, %v182_v8 }
  0x19   : > { %v190_v18 = vadd.f32 %v189_v15, %v183_v11 }
  0x1b   : > { %v191_v20 = vadd.f32 %v190_v18, %v184_v14 }
  0x1d   : > { %v192_v21 = vadd.f32 %v191_v20, %v185_v17 }
  0x1f   : > { %v193_v22 = vadd.f32 %v192_v21, %v186_v19 }
  0x21   : > { %v194_v23 = vrot.slane %v193_v22, 4 }
  0x23   : > { %v195_v24 = vadd.f32 %v194_v23, %v193_v22 }
  0x25   : > { %v196_v25 = vrot.slane %v195_v24, 2 }
  0x27   : > { %v197_v26 = vadd.f32 %v196_v25, %v195_v24 }
  0x29   : > { %v198_v27 = vrot.slane %v197_v26, 1 }
  0x2b   : > { %v199_v28 = vadd.f32 %v198_v27, %v197_v26 }
  0x2d   : > { %200 = vrot.lane.b32.xlu0 %v199_v28, %s357_s18  ;;  %206 = vrot.lane.b32.xlu1 %v199_v28, %s358_s19 }
  0x31   : > { %203 = vrot.lane.b32.xlu0 %v199_v28, %s359_s20 }
  0x9f   : > { %v201_v29 = vpop.permute.xlu0 %200  ;;  %v207_v32 = vpop.permute.xlu1 %206 }
  0xa0   : > { %v202_v30 = vadd.f32 %v201_v29, %v199_v28 }
  0xa3   : > { %v204_v31 = vpop.permute.xlu0 %203 }
  0xa4   : > { %v205_v33 = vadd.f32 %v204_v31, %v202_v30 }
  0xa6   : > { %v208_v34 = vadd.f32 %v207_v32, %v205_v33 }
  0xa8   : > { %345 = vrsqrt.f32 %v208_v34  ;;  %vm211_vm0 = vcmp.eq.f32.partialorder %v208_v34, inf  ;;  %v214_v37 = vand.u32 2147483648, %v208_v34  ;;  %vm213_vm2 = vcmp.eq.f32.partialorder %v208_v34, 0.0 }
  0xb2   : > { %v346_v35 = vpop.eup %345 }
  0xb3   : > { %v210_v36 = vmul.f32 %v346_v35, %v208_v34 }
  0xb5   : > { %v212_v38 = vsel %vm211_vm0, %v208_v34, %v210_v36 }
  0xb6   : > { %v215_v39 = vsel %vm213_vm2, %v214_v37, %v212_v38 }
  0xb7   : > { %v217_v40 = vsel %vm216_vm1, %v215_v39, 0.0 }
  0xb8   : > { %218 = vadd.xlane.f32.xlu1 %v217_v40 }
 0x145   : > { %v219_v41 = vpop.xlane.xlu1 %218 }
 0x146   : > { %v221_v42 = vmul.f32 0.0078125, %v219_v41 }
 0x148   : > { %v222_v43 = vadd.f32 1e-06, %v221_v42 }
 0x14a   : > { %347 = vrcp.f32 %v222_v43 }
 0x154   : > { %v348_v46 = vpop.eup %347 }
 0x155   : > { %v224_v48 = vmul.f32 %v348_v46, %v215_v39 }
 0x157   : > { %v226_v50 = vmul.f32 %v225_v47, %v224_v48 }
 0x159   : > { %v227_v51 = vadd.f32 1.0, %v226_v50 }
 0x15b   : > { %v232_v52 = vrot.slane %v227_v51, %v231_v49 }
 0x15d   : > { %v234_v54 = vmul.f32 %v232_v52, %v396_v0  ;;  %v235_v55 = vmul.f32 %v232_v52, %v398_v1  ;;  %v236_v56 = vmul.f32 %v232_v52, %v400_v2  ;;  %v237_v57 = vmul.f32 %v232_v52, %v402_v3 }
 0x15e   : > { %v238_v58 = vmul.f32 %v232_v52, %v410_v7  ;;  %v239_v59 = vmul.f32 %v232_v52, %v176_v10  ;;  %v240_v60 = vmul.f32 %v232_v52, %v177_v13  ;;  %v241_v61 = vmul.f32 %v232_v52, %v178_v16 }
 0x15f   : > { %v249_v62 = vadd.f32 %v329_v53, %v234_v54  ;;  %v250_v63 = vadd.f32 %v329_v53, %v235_v55  ;;  %v251_v4 = vadd.f32 %v329_v53, %v236_v56  ;;  %v252_v0 = vadd.f32 %v329_v53, %v237_v57 }
 0x160   : > { %v253_v5 = vadd.f32 %v329_v53, %v238_v58  ;;  %v254_v1 = vadd.f32 %v329_v53, %v239_v59  ;;  %v255_v6 = vadd.f32 %v329_v53, %v240_v60  ;;  %v256_v2 = vadd.f32 %v329_v53, %v241_v61 }
 0x161   : > { %257 = vst [vmem:[%s170_s27] sm:$0xff] %v249_v62  ;;  %258 = vst [vmem:[%s170_s27 + $0x8] sm:$0xff] %v250_v63 }
 0x162   : > { %259 = vst [vmem:[%s170_s27 + $0x10] sm:$0xff] %v251_v4  ;;  %260 = vst [vmem:[%s170_s27 + $0x18] sm:$0xff] %v252_v0 }
 0x163   : > { %261 = vst [vmem:[%s170_s27 + $0x20] sm:$0xff] %v253_v5  ;;  %262 = vst [vmem:[%s170_s27 + $0x28] sm:$0xff] %v254_v1 }
 0x164   : > { %263 = vst [vmem:[%s170_s27 + $0x30] sm:$0xff] %v255_v6  ;;  %264 = vst [vmem:[%s170_s27 + $0x38] sm:$0xff] %v256_v2 }
 0x165 PF: > { %s13_s12 = sadd.s32 1, %s355_s12  }
 0x166   : > { %p10_p4 = scmp.ge.s32.totalorder %s13_s12, 4  }
 0x168   :  { %12 = sbr.rel (!%p10_p4) target bundleno = 1 (0x1), region = 62 }

</bundles_post_ra>
